<compile_context>
chip_gen: v7x
topology: tpu7x:2x2x1
jax: 0.10.0
libtpu: 0.0.40
codegen_flags: <defaults>
</compile_context>

<pallas_src>
import functools

import jax
import jax.numpy as jnp
from jax import lax
from jax.experimental import pallas as pl
from jax.experimental.pallas import tpu as pltpu


def _wce_kernel(p_ref, tgt_ref, w_ref, acc_ref, *, approx_reciprocal):
    # acc_ref is a (2, tile_n) lane-dense accumulator (row 0 = weighted loss,
    # row 1 = valid count).  Its block index depends only on the parallel grid
    # axis, so it stays resident across the "arbitrary" (reduction) axis.
    @pl.when(pl.program_id(1) == 0)
    def _():
        acc_ref[...] = jnp.zeros_like(acc_ref)

    p = p_ref[...].astype(jnp.float32)      # (C, TN)  classes on sublanes
    tgt = tgt_ref[...]                      # (1, TN)  int32
    w_plus = w_ref[...]                     # (C, 1)   f32 (= 0.01 + class_weight)

    c, tn = p.shape
    valid = tgt >= 0                        # (1, TN)
    tgt_safe = jnp.where(valid, tgt, 0)

    class_ids = lax.broadcasted_iota(jnp.int32, (c, tn), 0)
    onehot_t = class_ids == tgt_safe        # exactly one True per column

    # Stable logsumexp pieces; p - col_max computed once and reused everywhere.
    col_max = jnp.max(p, axis=0, keepdims=True)
    pm = p - col_max                                            # (C, TN)
    sum_exp = jnp.sum(jnp.exp(pm), axis=0, keepdims=True)       # (1, TN)
    x_m = jnp.sum(jnp.where(onehot_t, pm, 0.0), axis=0, keepdims=True)
    # logsumexp(p) - p[target] == log(sum_exp) - pm[target]

    # 0.01 + min(weight[argmax], weight[target]) as ONE min-reduction over
    # {rows attaining the max} U {target row}.  pm == 0 reuses the broadcast
    # of col_max instead of a second compare against p.
    sel = jnp.logical_or(pm == 0.0, onehot_t)
    denom = jnp.min(jnp.where(sel, w_plus, jnp.inf), axis=0, keepdims=True)
    eff_w = pl.reciprocal(denom, approx=approx_reciprocal)      # EUP slot

    per_row = eff_w * (jnp.log(sum_exp) - x_m)                  # (1, TN)
    # Select (not multiply) so NaN/Inf from ragged/OOB logit columns never
    # propagates into the accumulator.
    loss_row = jnp.where(valid, per_row, 0.0)
    cnt_row = valid.astype(jnp.float32)

    # Fused (2, TN) update: row 0 <- loss, row 1 <- count (single RMW of acc).
    row_ids = lax.broadcasted_iota(jnp.int32, (2, tn), 0)
    acc_ref[...] += jnp.where(row_ids == 0, loss_row, cnt_row)


def _default_num_parallel():
    """TensorCores addressable by one Pallas program (2 on v4/v7x megacore)."""
    try:
        kind = jax.devices()[0].device_kind.lower()
    except Exception:
        return 1
    return 2 if ("v7" in kind or "v4" in kind) else 1


def weighted_cross_entropy_loss(p, target, class_weight, *,
                                class_major=False,
                                tile_n=None,
                                num_parallel=None,
                                approx_reciprocal=True,
                                vmem_budget_bytes=8 << 20):
    """Weighted cross-entropy loss (mean over rows with target >= 0).

    p: logits, (N, C) float (f32 or bf16), or (C, N) if class_major=True
       (recommended upstream layout: avoids a full extra HBM transpose pass).
    target: (N,) int labels; negative = ignored.
    class_weight: (C,) per-class weights.
    Returns a scalar.  If no row is valid the result is NaN (0/0), matching
    the PyTorch reference.
    """
    if class_major:
        C, N = p.shape
        p_cm = p
    else:
        N, C = p.shape
        # NOTE: one extra HBM read+write of the logits; produce (C, N) logits
        # upstream and pass class_major=True to avoid it.
        p_cm = p.T

    if p_cm.dtype != jnp.float32 and p_cm.dtype != jnp.bfloat16:
        p_cm = p_cm.astype(jnp.float32)
    in_itemsize = p_cm.dtype.itemsize

    if num_parallel is None:
        num_parallel = _default_num_parallel()
    num_parallel = max(1, int(num_parallel))

    # ---- tile sizing: big tiles, but VMEM-budgeted and pipeline-aware -------
    # Footprint estimate per column: 2x double-buffered input block + ~6 f32
    # (C, tile_n) temporaries in the body.  Budget (default 8 MiB) stays well
    # under every generation's default scoped VMEM (v5e 16 MiB, v7x 32 MiB).
    bytes_per_col = C * (2 * in_itemsize + 6 * 4) + 64
    cap = max(128, (int(vmem_budget_bytes) // bytes_per_col) // 128 * 128)
    if tile_n is None:
        tile_n = 8192
        # keep a handful of steps per core so the pipeline stays warm
        while tile_n > 512 and pl.cdiv(N, num_parallel * tile_n) < 4:
            tile_n //= 2
    tile_n = max(128, (int(tile_n) // 128) * 128)
    tile_n = min(tile_n, cap)

    chunk = num_parallel * tile_n
    steps = pl.cdiv(N, chunk)
    n_pad = steps * chunk

    # Only the tiny target vector is padded; padded rows carry -1 (=> masked).
    tgt = target.astype(jnp.int32)
    if n_pad != N:
        tgt = jnp.pad(tgt, (0, n_pad - N), constant_values=-1)
    tgt2d = tgt.reshape(1, n_pad)

    # Fold +0.01 into the weights (min commutes with adding a constant).
    w_plus = (class_weight.reshape(-1).astype(jnp.float32) + 0.01).reshape(C, 1)

    # The logits are NOT padded: ragged trailing columns are undefined on read
    # and masked by valid; fully-out-of-range blocks are clamped to the last
    # real block (their targets are all -1, so they contribute nothing).
    max_blk = pl.cdiv(N, tile_n) - 1

    def p_map(i, j):
        return (0, jnp.minimum(i * steps + j, max_blk))

    def t_map(i, j):
        return (0, i * steps + j)           # targets are padded: never clamp

    acc = pl.pallas_call(
        functools.partial(_wce_kernel, approx_reciprocal=approx_reciprocal),
        out_shape=jax.ShapeDtypeStruct((2, chunk), jnp.float32),
        grid_spec=pltpu.PrefetchScalarGridSpec(
            num_scalar_prefetch=0,
            grid=(num_parallel, steps),
            in_specs=[
                pl.BlockSpec((C, tile_n), p_map),
                pl.BlockSpec((1, tile_n), t_map),
                pl.BlockSpec((C, 1), lambda i, j: (0, 0)),
            ],
            out_specs=pl.BlockSpec((2, tile_n), lambda i, j: (0, i)),
        ),
        compiler_params=pltpu.CompilerParams(
            # "parallel" axis splits rows across TensorCores on megacore chips
            # (v4/v7x); it is a no-op on single-TC chips (v5e/v6e).
            dimension_semantics=("parallel", "arbitrary")),
    )(p_cm, tgt2d, w_plus)

    return jnp.sum(acc[0]) / jnp.sum(acc[1])


def _reference(p, target, class_weight, *, tie_min=False):
    # Pure-JAX reference mirroring the PyTorch module.  tie_min=True switches
    # to the kernel's tie rule (min weight over all argmax-tied classes),
    # which only differs from PyTorch on exact logit ties.
    valid = target >= 0
    tgt = jnp.where(valid, target, 0)
    lse = jax.nn.logsumexp(p, axis=1)
    x_class = jnp.take_along_axis(p, tgt[:, None], axis=1)[:, 0]
    pt = class_weight[tgt]
    if tie_min:
        is_max = p == jnp.max(p, axis=1, keepdims=True)
        pw = jnp.min(jnp.where(is_max, class_weight[None, :], jnp.inf), axis=1)
    else:
        pw = class_weight[jnp.argmax(p, axis=1)]
    w = 1.0 / (0.01 + jnp.minimum(pw, pt))
    per_row = jnp.where(valid, w * (lse - x_class), 0.0)
    return jnp.sum(per_row) / jnp.sum(valid.astype(jnp.float32))


if __name__ == "__main__":
    key = jax.random.PRNGKey(0)
    k1, k2, k3, k4 = jax.random.split(key, 4)

    # --- main test: module-shaped (N, C) f32 inputs, auto tiling -------------
    N, C = 2000, 8
    p = jax.random.normal(k1, (N, C), dtype=jnp.float32)
    target = jax.random.randint(k2, (N,), -1, C, dtype=jnp.int32)   # -1 => ignored
    class_weight = jnp.linspace(0.5, 2.0, C, dtype=jnp.float32)

    loss = weighted_cross_entropy_loss(p, target, class_weight)
    jax.block_until_ready(loss)
    ref = _reference(p, target, class_weight)
    assert jnp.allclose(loss, ref, rtol=2e-3, atol=2e-3), (loss, ref)

    # --- bf16 logits kept bf16 in HBM, small tile, 2-way parallel, ragged edge
    N2 = 200
    p2 = jax.random.normal(k3, (N2, C), dtype=jnp.bfloat16)
    t2 = jax.random.randint(k4, (N2,), -1, C, dtype=jnp.int32)
    loss2 = weighted_cross_entropy_loss(p2, t2, class_weight,
                                        tile_n=256, num_parallel=2)
    jax.block_until_ready(loss2)
    # bf16 can create exact argmax ties; compare against the tie-union rule.
    ref2 = _reference(p2.astype(jnp.float32), t2, class_weight, tie_min=True)
    assert jnp.allclose(loss2, ref2, rtol=2e-3, atol=2e-3), (loss2, ref2)

    # --- ScanNet-like class count (C=21, not a multiple of 8), class-major ---
    N3, C3 = 1000, 21
    w3 = jnp.linspace(0.3, 3.0, C3, dtype=jnp.float32)
    p3_cm = jax.random.normal(k1, (C3, N3), dtype=jnp.float32)  # (C, N): no transpose pass
    t3 = jax.random.randint(k2, (N3,), -1, C3, dtype=jnp.int32)
    loss3 = weighted_cross_entropy_loss(p3_cm, t3, w3, class_major=True, tile_n=512)
    jax.block_until_ready(loss3)
    ref3 = _reference(p3_cm.T, t3, w3)
    assert jnp.allclose(loss3, ref3, rtol=2e-3, atol=2e-3), (loss3, ref3)

    print("KERNEL_OK")
</pallas_src>

<mosaic_0001>
module attributes {stable_mosaic.version = 11 : i64} {
  func.func @_wce_kernel(%arg0: i32, %arg1: i32, %arg2: memref<8x512xf32, #tpu.memory_space<vmem>>, %arg3: memref<1x512xi32, #tpu.memory_space<vmem>>, %arg4: memref<8x1xf32, #tpu.memory_space<vmem>>, %arg5: memref<2x512xf32, #tpu.memory_space<vmem>>) attributes {dimension_semantics = [#tpu.dimension_semantics<parallel>, #tpu.dimension_semantics<arbitrary>], iteration_bounds = array<i64: 1, 4>, scalar_prefetch = 0 : i64, scratch_operands = 0 : i64, tpu.core_type = #tpu.core_type<tc>, window_params = [{transform_indices = @transform_0, window_bounds = array<i64: 8, 512>}, {transform_indices = @transform_1, window_bounds = array<i64: 1, 512>}, {pipeline_mode = #tpu.pipeline_mode<synchronous>, transform_indices = @transform_2, window_bounds = array<i64: 8, 1>}, {transform_indices = @transform_3, window_bounds = array<i64: 2, 512>}]} {
    %c0_i32 = arith.constant 0 : i32
    %0 = arith.cmpi eq, %arg1, %c0_i32 : i32
    %1 = arith.extui %0 : i1 to i32
    %c0_i32_0 = arith.constant 0 : i32
    %2 = arith.cmpi ne, %1, %c0_i32_0 : i32
    scf.if %2 {
      %cst_20 = arith.constant 0.000000e+00 : f32
      %52 = vector.broadcast %cst_20 : f32 to vector<2x512xf32>
      %c0_21 = arith.constant 0 : index
      %c0_22 = arith.constant 0 : index
      %53 = vector.load %arg5[%c0_21, %c0_22] : memref<2x512xf32, #tpu.memory_space<vmem>>, vector<2x512xf32>
      tpu.vector_store %arg5[%c0_21, %c0_22], %52 {strides = array<i32>} : memref<2x512xf32, #tpu.memory_space<vmem>>, vector<2x512xf32>,
    } else {
    }
    %c0 = arith.constant 0 : index
    %c0_1 = arith.constant 0 : index
    %3 = vector.load %arg2[%c0, %c0_1] : memref<8x512xf32, #tpu.memory_space<vmem>>, vector<8x512xf32>
    %c0_2 = arith.constant 0 : index
    %c0_3 = arith.constant 0 : index
    %4 = vector.load %arg3[%c0_2, %c0_3] : memref<1x512xi32, #tpu.memory_space<vmem>>, vector<1x512xi32>
    %c0_4 = arith.constant 0 : index
    %c0_5 = arith.constant 0 : index
    %5 = vector.load %arg4[%c0_4, %c0_5] : memref<8x1xf32, #tpu.memory_space<vmem>>, vector<8x1xf32>
    %c0_i32_6 = arith.constant 0 : i32
    %6 = vector.broadcast %c0_i32_6 : i32 to vector<1x512xi32>
    %7 = arith.cmpi sge, %4, %6 : vector<1x512xi32>
    %c0_i32_7 = arith.constant 0 : i32
    %8 = vector.broadcast %c0_i32_7 : i32 to vector<1x512xi32>
    %9 = arith.select %7, %4, %8 : vector<1x512xi1>, vector<1x512xi32>
    %10 = tpu.iota {dimensions = array<i32: 0>} : vector<8x512xi32>
    %11 = vector.broadcast %9 : vector<1x512xi32> to vector<8x512xi32>
    %12 = arith.cmpi eq, %10, %11 : vector<8x512xi32>
    %cst = arith.constant dense<0xFF800000> : vector<512xf32>
    %13 = vector.multi_reduction <maximumf>, %3, %cst [0] : vector<8x512xf32> to vector<512xf32>
    %14 = vector.shape_cast %13 : vector<512xf32> to vector<1x512xf32>
    %15 = vector.broadcast %14 : vector<1x512xf32> to vector<8x512xf32>
    %16 = arith.subf %3, %15 : vector<8x512xf32>
    %17 = math.exp %16 : vector<8x512xf32>
    %cst_8 = arith.constant dense<0.000000e+00> : vector<512xf32>
    %18 = vector.multi_reduction <add>, %17, %cst_8 [0] : vector<8x512xf32> to vector<512xf32>
    %19 = vector.shape_cast %18 : vector<512xf32> to vector<1x512xf32>
    %cst_9 = arith.constant 0.000000e+00 : f32
    %20 = vector.broadcast %cst_9 : f32 to vector<8x512xf32>
    %21 = arith.select %12, %16, %20 : vector<8x512xi1>, vector<8x512xf32>
    %cst_10 = arith.constant dense<0.000000e+00> : vector<512xf32>
    %22 = vector.multi_reduction <add>, %21, %cst_10 [0] : vector<8x512xf32> to vector<512xf32>
    %23 = vector.shape_cast %22 : vector<512xf32> to vector<1x512xf32>
    %cst_11 = arith.constant 0.000000e+00 : f32
    %24 = vector.broadcast %cst_11 : f32 to vector<8x512xf32>
    %25 = arith.cmpf oeq, %16, %24 : vector<8x512xf32>
    %26 = arith.ori %25, %12 : vector<8x512xi1>
    %cst_12 = arith.constant 0x7F800000 : f32
    %27 = vector.shape_cast %5 : vector<8x1xf32> to vector<8x1xf32>
    %28 = vector.broadcast %27 : vector<8x1xf32> to vector<8x512xf32>
    %29 = vector.broadcast %cst_12 : f32 to vector<8x512xf32>
    %30 = arith.select %26, %28, %29 : vector<8x512xi1>, vector<8x512xf32>
    %cst_13 = arith.constant dense<0x7F800000> : vector<512xf32>
    %31 = vector.multi_reduction <minimumf>, %30, %cst_13 [0] : vector<8x512xf32> to vector<512xf32>
    %32 = vector.shape_cast %31 : vector<512xf32> to vector<1x512xf32>
    %33 = tpu.reciprocal %32 {approx = true} : vector<1x512xf32> -> vector<1x512xf32>
    %34 = math.log %19 : vector<1x512xf32>
    %35 = arith.subf %34, %23 : vector<1x512xf32>
    %36 = arith.mulf %33, %35 : vector<1x512xf32>
    %cst_14 = arith.constant 0.000000e+00 : f32
    %37 = vector.broadcast %cst_14 : f32 to vector<1x512xf32>
    %38 = arith.select %7, %36, %37 : vector<1x512xi1>, vector<1x512xf32>
    %39 = arith.extui %7 : vector<1x512xi1> to vector<1x512xi32>
    %40 = arith.sitofp %39 : vector<1x512xi32> to vector<1x512xf32>
    %41 = tpu.iota {dimensions = array<i32: 0>} : vector<2x512xi32>
    %c0_15 = arith.constant 0 : index
    %c0_16 = arith.constant 0 : index
    %42 = vector.load %arg5[%c0_15, %c0_16] : memref<2x512xf32, #tpu.memory_space<vmem>>, vector<2x512xf32>
    %c0_i32_17 = arith.constant 0 : i32
    %43 = vector.broadcast %c0_i32_17 : i32 to vector<2x512xi32>
    %44 = arith.cmpi eq, %41, %43 : vector<2x512xi32>
    %45 = vector.shape_cast %38 : vector<1x512xf32> to vector<1x512xf32>
    %46 = vector.broadcast %45 : vector<1x512xf32> to vector<2x512xf32>
    %47 = vector.shape_cast %40 : vector<1x512xf32> to vector<1x512xf32>
    %48 = vector.broadcast %47 : vector<1x512xf32> to vector<2x512xf32>
    %49 = arith.select %44, %46, %48 : vector<2x512xi1>, vector<2x512xf32>
    %50 = arith.addf %42, %49 : vector<2x512xf32>
    %c0_18 = arith.constant 0 : index
    %c0_19 = arith.constant 0 : index
    %51 = vector.load %arg5[%c0_18, %c0_19] : memref<2x512xf32, #tpu.memory_space<vmem>>, vector<2x512xf32>
    tpu.vector_store %arg5[%c0_18, %c0_19], %50 {strides = array<i32>} : memref<2x512xf32, #tpu.memory_space<vmem>>, vector<2x512xf32>,
    return
  }
  func.func @transform_0(%arg0: i32, %arg1: i32) -> (i32, i32) {
    %c4_i32 = arith.constant 4 : i32
    %0 = arith.muli %arg0, %c4_i32 : i32
    %1 = arith.addi %0, %arg1 : i32
    %c3_i32 = arith.constant 3 : i32
    %2 = arith.minsi %1, %c3_i32 : i32
    %c0_i32 = arith.constant 0 : i32
    %c0_i32_0 = arith.constant 0 : i32
    return %c0_i32, %2 : i32, i32
  }
  func.func @transform_1(%arg0: i32, %arg1: i32) -> (i32, i32) {
    %c4_i32 = arith.constant 4 : i32
    %0 = arith.muli %arg0, %c4_i32 : i32
    %1 = arith.addi %0, %arg1 : i32
    %c0_i32 = arith.constant 0 : i32
    %c0_i32_0 = arith.constant 0 : i32
    return %c0_i32, %1 : i32, i32
  }
  func.func @transform_2(%arg0: i32, %arg1: i32) -> (i32, i32) {
    %c0_i32 = arith.constant 0 : i32
    %c0_i32_0 = arith.constant 0 : i32
    %c0_i32_1 = arith.constant 0 : i32
    return %c0_i32, %c0_i32_0 : i32, i32
  }
  func.func @transform_3(%arg0: i32, %arg1: i32) -> (i32, i32) {
    %c0_i32 = arith.constant 0 : i32
    %c0_i32_0 = arith.constant 0 : i32
    return %c0_i32, %arg0 : i32, i32
  }
}

</mosaic_0001>

<bundles_post_ra>
// kernel: tpu_custom_call.1
= control target key start
LH: loop header
LB: loop body
LE: loop exit
PB: predicated region body
PF: predicated region fallthrough
CT: control target
= control target key end

     0   :  { %8 = vsyncpa [#allocation3], 0  ;;  %s1312_s0 = inlined_call_operand.hbm [shape: f32[8,2000], index: 0, kind: input, shape index: {}]   ;;  %s1313_s1 = inlined_call_operand.hbm [shape: s32[1,2048], index: 1, kind: input, shape index: {}]   ;;  %s1314_s2 = inlined_call_operand.vmem [shape: f32[8,1], index: 2, kind: input, shape index: {}]   ;;  %s1315_s3 = inlined_call_operand.hbm [shape: f32[2,512], index: 3, kind: output, shape index: {}]  }
   0x1   :  { %10 = vsyncpa [#allocation3 + $0x1], 0 }
   0x2   :  { %11 = vsyncpa [#allocation6], 0 }
   0x3   :  { %13 = vsyncpa [#allocation6 + $0x1], 0 }
   0x4   :  { %14 = vsyncpa [#allocation4], 0  ;;  %s980_s12 = smov 0   ;;  %s982_s13 = smov 0  }
   0x5   :  { %s984_s14 = smov 0   ;;  %s986_s15 = smov 0  }
   0x6   :  { %s988_s16 = smov 0   ;;  %s990_s17 = smov 0  }
   0x7   :  { %s992_s18 = smov 0   ;;  %s994_s19 = smov 0  }
   0x8   :  { %s996_s20 = smov 0  }
   0x9 LB: > { %s641_s21 = sadd.s32 4294967295, %s950_s20   ;;  %s29_s22 = sadd.s32 1, %s946_s19  ;;  %s950_s20 = sphi %s996_s20, %s20_s20   ;;  %s946_s19 = sphi %s994_s19, %s1346_s19   ;;  %s942_s18 = sphi %s992_s18, %s1345_s18   ;;  %s938_s17 = sphi %s990_s17, %s1344_s17   ;;  %s934_s16 = sphi %s988_s16, %s1343_s16   ;;  %s930_s15 = sphi %s986_s15, %s1342_s15   ;;  %s926_s14 = sphi %s984_s14, %s1341_s14   ;;  %s922_s13 = sphi %s982_s13, %s1340_s13   ;;  %s918_s12 = sphi %s980_s12, %s1339_s12  }
   0xa   : > { %p30_p0 = scmp.ge.s32.totalorder %s29_s22, 4  ;;  %p38_p1 = scmp.lt.s32.totalorder %s946_s19, 3 }
   0xb   : > { %s47_s23 = sadd.s32 1, %s938_s17  ;;  %p54_p2 = scmp.ne.s32.totalorder %s938_s17, %s934_s16 }
   0xc   : > { %s1348_s22 = smov (%p30_p0, %s29_s22), 0  ;;  %p1317_p4 = scmp.eq.s32.totalorder %s950_s20, 0 }
   0xd   : > { %s39_s24 = scalar_select %p38_p1, %s946_s19, 3 }
   0xe   : > { %p42_p3 = scmp.lt.s32.totalorder %s1348_s22, 3  ;;  %p60_p5 = scmp.ne.s32.totalorder %s934_s16, %s930_s15 }
   0xf   : > { %p1037_p6 = scmp.eq.s32.totalorder %s641_s21, 0  ;;  %p56_p7 = por %p1317_p4, %p54_p2 }
  0x10   : > { %s43_s26 = scalar_select %p42_p3, %s1348_s22, 3 }
  0x11   : > { %p1046_p8 = por %p1037_p6, %p60_p5  ;;  %p1316_p10 = scmp.lt.s32.totalorder %s950_s20, 4 }
  0x12   : > { %s44_s28 = ssub.s32 %s39_s24, %s43_s26  ;;  %s164_s29 = sand.u32 1, %s938_s17  }
  0x13   : > { %s1321_s27 = scalar_select %p1046_p8, 1, 0 }
  0x14   : > { %p45_p9 = scmp.eq.s32.totalorder %s44_s28, 0  ;;  %s659_s30 = sshll.u32 %s39_s24, 9 }
  0x15   : > { %s644_s5 = sshll.u32 %s164_s29, 5  ;;  %s1058_s8 = scalar_lea.hbm %s1312_s0, %s659_s30 }
  0x16   : > { %s1053_s4 = scalar_select %p45_p9, %s938_s17, %s47_s23  }
  0x17   : > { %s168_s9 = scalar_lea.vmem [#allocation2], %s644_s5  ;;  %p1062_p11 = pnand %p1316_p10, %p56_p7 }
  0x18   : > { %s180_s10 = sshll.u32 %s168_s9, 4  ;;  %s165_s15 = scalar_lea.sflag [#allocation3], %s164_s29  ;;  %s1066_s10 = int_to_ptr.vmem [resolvable:$true] %s180_s10 }
  0x19   : > { %s782_s23 = scalar_lea.hbm %s1058_s8, 512  ;;  %p784_p1 = pneg %p1062_p11 }
  0x1a   : > { %p783_p0 = scmp.ne.s32.totalorder %s1058_s8, %s782_s23  ;;  %s787_s28 = scalar_lea.hbm %s1312_s0, 2048 }
  0x1b   : > { %p788_p5 = scmp.lt.u32.totalorder %s1058_s8, %s1312_s0  ;;  %p789_p7 = scmp.lt.u32.totalorder %s787_s28, %s782_s23 }
  0x1c   : > { %p785_p2 = pnand %p784_p1, %p783_p0  ;;  %p791_p10 = scmp.lt.u32.totalorder %s782_s23, %s1058_s8 }
  0x1d   : > { %p790_p9 = por %p789_p7, %p788_p5 }
  0x1e   : > { %p786_p3 = pneg %p785_p2 }
  0x1f   : > { %p792_p4 = por %p791_p10, %p790_p9 }
  0x21   : > { %p793_p12 = pnand %p792_p4, %p786_p3 }
  0x23   : > { %796 = shalt.err (!%p793_p12)
}
  0x24   : > { %s797_s29 = scalar_lea.vmem %s1066_s10, 512  ;;  %s952_s6 = smov [#allocation2]  }
  0x25   : > { %p798_p0 = scmp.ne.s32.totalorder %s1066_s10, %s797_s29  ;;  %s802_s7 = sshll.u32 %s952_s6, 4  ;;  %s803_s7 = int_to_ptr.vmem [resolvable:$false] %s802_s7 }
  0x26   : > { %s804_s9 = scalar_lea.vmem %s803_s7, 1024  ;;  %p805_p8 = scmp.lt.s32.totalorder %s1066_s10, %s803_s7 }
  0x27   : > { %p800_p2 = pnand %p798_p0, %p784_p1  ;;  %p806_p5 = scmp.lt.s32.totalorder %s804_s9, %s797_s29 }
  0x29   : > { %p801_p13 = pneg %p800_p2  ;;  %p807_p7 = por %p806_p5, %p805_p8 }
  0x2b   : > { %p808_p10 = pnand %p807_p7, %p801_p13 }
  0x2d   : > { %811 = shalt.err (!%p808_p10)
}
  0x2e   : > { %672 = dma.hbm_to_vmem [thread:$0]  (!%p1062_p11), %s1058_s8, 512, %s1066_s10, %s165_s15  }
  0x2f   : > { %p1323_p4 = scmp.lt.s32.totalorder %s950_s20, 5  ;;  %p1324_p8 = scmp.ge.s32.totalorder %s950_s20, 1 }
  0x30   : > { %s74_s23 = ssub.s32 %s946_s19, %s1348_s22  ;;  %s77_s24 = sadd.s32 1, %s926_s14 }
  0x31   : > { %p1099_p12 = pnand %p1324_p8, %p1323_p4  ;;  %p75_p13 = scmp.eq.s32.totalorder %s74_s23, 0 }
  0x32   : > { %p84_p1 = scmp.ne.s32.totalorder %s926_s14, %s922_s13  ;;  %p90_p3 = scmp.ne.s32.totalorder %s922_s13, %s918_s12 }
  0x33   : > { %s1111_s26 = scalar_select %p75_p13, %s926_s14, %s77_s24  }
  0x34   : > { %p1326_p9 = scmp.eq.s32.totalorder %s950_s20, 0  ;;  %p1117_p2 = por %p90_p3, %p1037_p6 }
  0x35   : > { %s187_s8 = sand.u32 1, %s926_s14   ;;  %s660_s10 = sshll.u32 %s946_s19, 6 }
  0x36   : > { %p86_p0 = por %p84_p1, %p1326_p9  ;;  %s647_s15 = sshll.u32 %s187_s8, 2 }
  0x37   : > { %s1327_s28 = scalar_select %p1117_p2, 1, 0 }
  0x38   : > { %s1126_s29 = scalar_lea.hbm %s1313_s1, %s660_s10  ;;  %s191_s12 = scalar_lea.vmem [#allocation5], %s647_s15 }
  0x39   : > { %s201_s6 = sshll.u32 %s191_s12, 4  ;;  %p1328_p11 = scmp.lt.s32.totalorder %s950_s20, 4  ;;  %s1134_s6 = int_to_ptr.vmem [resolvable:$true] %s201_s6 }
  0x3a   : > { %s188_s7 = scalar_lea.sflag [#allocation6], %s187_s8  ;;  %s812_s9 = scalar_lea.hbm %s1126_s29, 64 }
  0x3b   : > { %p1130_p5 = pnand %p1328_p11, %p86_p0  ;;  %p813_p6 = scmp.ne.s32.totalorder %s1126_s29, %s812_s9 }
  0x3c   : > { %s817_s10 = scalar_lea.hbm %s1313_s1, 256  ;;  %p818_p8 = scmp.lt.u32.totalorder %s1126_s29, %s1313_s1 }
  0x3d   : > { %p814_p7 = pneg %p1130_p5  ;;  %p819_p13 = scmp.lt.u32.totalorder %s817_s10, %s812_s9 }
  0x3e   : > { %p821_p3 = scmp.lt.u32.totalorder %s812_s9, %s1126_s29 }
  0x3f   : > { %p815_p10 = pnand %p814_p7, %p813_p6  ;;  %p820_p1 = por %p819_p13, %p818_p8 }
  0x41   : > { %p816_p4 = pneg %p815_p10  ;;  %p822_p9 = por %p821_p3, %p820_p1 }
  0x43   : > { %p823_p0 = pnand %p822_p9, %p816_p4 }
  0x45   : > { %826 = shalt.err (!%p823_p0)
}
  0x46   : > { %s827_s8 = scalar_lea.vmem %s1134_s6, 64  ;;  %s953_s5 = smov [#allocation5]  }
  0x47   : > { %p828_p11 = scmp.ne.s32.totalorder %s1134_s6, %s827_s8  ;;  %s832_s12 = sshll.u32 %s953_s5, 4  ;;  %s833_s12 = int_to_ptr.vmem [resolvable:$false] %s832_s12 }
  0x48   : > { %s834_s23 = scalar_lea.vmem %s833_s12, 128  ;;  %p835_p2 = scmp.lt.s32.totalorder %s1134_s6, %s833_s12 }
  0x49   : > { %p830_p6 = pnand %p828_p11, %p814_p7  ;;  %p836_p8 = scmp.lt.s32.totalorder %s834_s23, %s827_s8 }
  0x4b   : > { %p831_p10 = pneg %p830_p6  ;;  %p837_p13 = por %p836_p8, %p835_p2 }
  0x4d   : > { %p838_p1 = pnand %p837_p13, %p831_p10 }
  0x4f   : > { %841 = shalt.err (!%p838_p1)
}
  0x50   : > { %675 = dma.hbm_to_vmem [thread:$0]  (!%p1130_p5), %s1126_s29, 64, %s1134_s6, %s188_s7  }
  0x51   : > { %210 = sbr.rel (%p1099_p12) target bundleno = 296 (0x128), region = 32  ;;  %s212_s9 = sand.u32 (!%p1099_p12), 1, %s934_s16  }
  0x52   : > { %s651_s24 = sshll.u32 (!%p1099_p12), %s212_s9, 5  ;;  %s213_s10 = scalar_lea.sflag (!%p1099_p12), [#allocation3], %s212_s9 }
  0x53   : > { %s216_s15 = scalar_lea.vmem (!%p1099_p12), [#allocation2], %s651_s24  ;;  %p1330_p7 = scmp.ne.s32.totalorder (!%p1099_p12), %s1321_s27, 0 }
  0x58   : > { %905 = dma.done.wait (%p1330_p7), %s213_s10, 512  }
  0x59   : > { %907 = vsyncadd (%p1330_p7), %s213_s10, 4294966784  ;;  %s221_s25 = sand.u32 1, %s922_s13   ;;  %p1331_p12 = scmp.ne.s32.totalorder %s1327_s28, 0 }
  0x5a   : > { %s1169_s30 = sshll.u32 %s221_s25, 2  ;;  %s222_s29 = scalar_lea.sflag [#allocation6], %s221_s25 }
  0x5b   : > { %s225_s11 = scalar_lea.vmem [#allocation5], %s1169_s30 }
  0x5c   : > { %909 = dma.done.wait (%p1331_p12), %s222_s29, 64  }
  0x5d   : > { %911 = vsyncadd (%p1331_p12), %s222_s29, 4294967232  ;;  %p653_p2 = scmp.ne.s32.totalorder %s942_s18, 0 }
  0x5e   : > { %v954_v0 = vmov (!%p653_p2), 0.0  }
  0x5f   : > { %260 = sbr.rel (%p653_p2) target bundleno = 102 (0x66), region = 44  ;;  %261 = vst [vmem:[#allocation7] sm:$0xff] (!%p653_p2), %v954_v0 }
  0x66 PF: > { %v267_v1 = vld [vmem:[%s1314_s2] sm:$0xff]  ;;  %v955_v2 = vmov 0   ;;  %v263_v4 = vld [vmem:[%s216_s15 + $0x8] sm:$0xff]  ;;  %v264_v6 = vld [vmem:[%s216_s15 + $0x10] sm:$0xff]  ;;  %v270_v40 = vlaneseq  ;;  %s959_s18 = smov [#allocation7]   ;;  %p1259_p5 = scmp.eq.s32.totalorder %s641_s21, 3 }
  0x67   : > { %757 = vset.pattern.permute.xlu0 %v955_v2  ;;  %v262_v3 = vld [vmem:[%s216_s15] sm:$0xff]  ;;  %v298_v7 = vrot.slane %v263_v4, 4  ;;  %v265_v8 = vld [vmem:[%s216_s15 + $0x18] sm:$0xff]  ;;  %v304_v10 = vrot.slane %v264_v6, 4  ;;  %s555_s28 = sshll.u32 %s959_s18, 4  ;;  %s556_s28 = int_to_ptr.vmem [resolvable:$true] %s555_s28 }
  0x68   : > { %390 = vperm.xlu0 %757, %v267_v1   ;;  %v292_v5 = vrot.slane %v262_v3, 4  ;;  %v310_v12 = vrot.slane %v265_v8, 4  ;;  %v1188_v44 = vld [vmem:[%s225_s11] sm:$0xf]  ;;  %v1190_v45 = vshrl.u32 %v270_v40, 7  ;;  %s842_s8 = scalar_lea.vmem %s556_s28, 128  ;;  %p849_p0 = scmp.lt.s32.totalorder %s556_s28, %s556_s28 }
  0x69   : > { %v299_v11 = vmax.f32 %v263_v4, %v298_v7  ;;  %v305_v14 = vmax.f32 %v264_v6, %v304_v10  ;;  %vm268_vm0 = vcmp.ge.s32.totalorder %v1188_v44, 0  ;;  %p843_p4 = scmp.ne.s32.totalorder %s556_s28, %s842_s8  ;;  %p850_p11 = scmp.lt.s32.totalorder %s842_s8, %s842_s8 }
  0x6a   : > { %v293_v9 = vmax.f32 %v262_v3, %v292_v5  ;;  %v311_v16 = vmax.f32 %v265_v8, %v310_v12  ;;  %v1194_v50 = vsub.s32 0, %v1190_v45  ;;  %v269_v51 = vsel %vm268_vm0, %v1188_v44, 0 }
  0x6b   : > { %v300_v15 = vrot.slane %v299_v11, 2  ;;  %v306_v18 = vrot.slane %v305_v14, 2  ;;  %v1200_v54 = vsub.s32 1, %v1190_v45  ;;  %v1203_v57 = vsub.s32 2, %v1190_v45  ;;  %p844_p3 = pnand %p843_p4, %p1259_p5  ;;  %p851_p6 = por %p850_p11, %p849_p0 }
  0x6c   : > { %v294_v13 = vrot.slane %v293_v9, 2  ;;  %v312_v20 = vrot.slane %v311_v16, 2  ;;  %v1206_v58 = vsub.s32 3, %v1190_v45  ;;  %v275_v59 = vrot.slane %v269_v51, %v1194_v50 }
  0x6d   : > { %v301_v19 = vmax.f32 %v299_v11, %v300_v15  ;;  %v307_v22 = vmax.f32 %v305_v14, %v306_v18  ;;  %v279_v62 = vrot.slane %v269_v51, %v1200_v54  ;;  %v283_v1 = vrot.slane %v269_v51, %v1203_v57  ;;  %p845_p9 = pneg %p844_p3 }
  0x6e   : > { %v295_v17 = vmax.f32 %v293_v9, %v294_v13  ;;  %v313_v24 = vmax.f32 %v311_v16, %v312_v20  ;;  %v287_v2 = vrot.slane %v269_v51, %v1206_v58  ;;  %vm1213_vm1 = vcmp.eq.s32.totalorder %v1190_v45, %v275_v59 }
  0x6f   : > { %v302_v23 = vrot.slane %v301_v19, 1  ;;  %v308_v26 = vrot.slane %v307_v22, 1  ;;  %vm1220_vm2 = vcmp.eq.s32.totalorder %v1190_v45, %v279_v62  ;;  %vm290_vm5 = vcmp.eq.s32.totalorder %v1190_v45, %v283_v1  ;;  %p852_p10 = pnand %p851_p6, %p845_p9 }
  0x70   : > { %v296_v21 = vrot.slane %v295_v17, 1  ;;  %v314_v28 = vrot.slane %v313_v24, 1  ;;  %vm291_vm6 = vcmp.eq.s32.totalorder %v1190_v45, %v287_v2  ;;  %vm474_vm13 = vcmp.eq.s32.totalorder %v1190_v45, 0 }
  0x71   : > { %v303_v27 = vmax.f32 %v301_v19, %v302_v23  ;;  %v309_v29 = vmax.f32 %v307_v22, %v308_v26 }
  0x72   : > { %v297_v25 = vmax.f32 %v295_v17, %v296_v21  ;;  %v315_v31 = vmax.f32 %v313_v24, %v314_v28 }
  0x73   : > { %v1180_v32 = vsub.f32 %v263_v4, %v303_v27  ;;  %v1182_v33 = vsub.f32 %v264_v6, %v309_v29 }
  0x74   : > { %v316_v30 = vsub.f32 %v262_v3, %v297_v25  ;;  %v319_v35 = vsub.f32 %v265_v8, %v315_v31 }
  0x75   : > { %v322_v36 = vmul.f32 1.442695, %v1180_v32  ;;  %v324_v37 = vmul.f32 1.442695, %v1182_v33  ;;  %v353_v10 = vsel %vm1220_vm2, %v1180_v32, 0.0  ;;  %vm381_vm4 = vcmp.eq.f32.partialorder %v1180_v32, 0.0 }
  0x76   : > { %v320_v34 = vmul.f32 1.442695, %v316_v30  ;;  %v326_v38 = vmul.f32 1.442695, %v319_v35  ;;  %v352_v6 = vsel %vm1213_vm1, %v316_v30, 0.0  ;;  %vm380_vm3 = vcmp.eq.f32.partialorder %v316_v30, 0.0  ;;  %vm385_vm10 = vmor %vm381_vm4, %vm1220_vm2 }
  0x77   : > { %v356_v11 = vrot.slane %v352_v6, 4  ;;  %vm382_vm7 = vcmp.eq.f32.partialorder %v1182_v33, 0.0  ;;  %v354_v14 = vsel %vm290_vm5, %v1182_v33, 0.0  ;;  %vm383_vm8 = vcmp.eq.f32.partialorder %v319_v35, 0.0  ;;  %vm1234_vm9 = vmor %vm380_vm3, %vm1213_vm1 }
  0x78   : > { %758 = vpow2.f32 %v320_v34  ;;  %v355_v18 = vsel %vm291_vm6, %v319_v35, 0.0  ;;  %v362_v19 = vrot.slane %v353_v10, 4  ;;  %vm386_vm11 = vmor %vm382_vm7, %vm290_vm5  ;;  %v368_v22 = vrot.slane %v354_v14, 4 }
  0x79   : > { %760 = vpow2.f32 %v322_v36  ;;  %vm387_vm12 = vmor %vm383_vm8, %vm291_vm6  ;;  %v374_v23 = vrot.slane %v355_v18, 4  ;;  %v357_v26 = vadd.f32 %v356_v11, %v352_v6 }
  0x7a   : > { %762 = vpow2.f32 %v324_v37  ;;  %v363_v27 = vadd.f32 %v362_v19, %v353_v10  ;;  %v369_v37 = vadd.f32 %v368_v22, %v354_v14  ;;  %v956_v19 = vmov 1966171168  }
  0x7b   : > { %764 = vpow2.f32 %v326_v38  ;;  %v375_v38 = vadd.f32 %v374_v23, %v355_v18 }
  0x82   : > { %v759_v39 = vpop.eup %758 }
  0x83   : > { %v761_v41 = vpop.eup %760  ;;  %v328_v42 = vrot.slane %v759_v39, 4 }
  0x84   : > { %v763_v43 = vpop.eup %762  ;;  %v334_v46 = vrot.slane %v761_v41, 4 }
  0x85   : > { %v765_v47 = vpop.eup %764  ;;  %v329_v48 = vadd.f32 %v759_v39, %v328_v42  ;;  %v340_v49 = vrot.slane %v763_v43, 4 }
  0x86   : > { %v335_v52 = vadd.f32 %v761_v41, %v334_v46  ;;  %v346_v53 = vrot.slane %v765_v47, 4  ;;  %v364_v46 = vrot.slane %v363_v27, 2 }
  0x87   : > { %v330_v55 = vrot.slane %v329_v48, 2  ;;  %v341_v56 = vadd.f32 %v763_v43, %v340_v49  ;;  %v358_v43 = vrot.slane %v357_v26, 2 }
  0x88   : > { %v336_v60 = vrot.slane %v335_v52, 2  ;;  %v347_v61 = vadd.f32 %v765_v47, %v346_v53  ;;  %v376_v53 = vrot.slane %v375_v38, 2  ;;  %v365_v62 = vadd.f32 %v364_v46, %v363_v27 }
  0x89   : > { %v331_v63 = vadd.f32 %v330_v55, %v329_v48  ;;  %v342_v0 = vrot.slane %v341_v56, 2 }
  0x8a   : > { %v337_v4 = vadd.f32 %v336_v60, %v335_v52  ;;  %v348_v5 = vrot.slane %v347_v61, 2  ;;  %v370_v52 = vrot.slane %v369_v37, 2 }
  0x8b   : > { %v332_v8 = vrot.slane %v331_v63, 1  ;;  %v343_v9 = vadd.f32 %v342_v0, %v341_v56 }
  0x8c   : > { %v338_v12 = vrot.slane %v337_v4, 1  ;;  %v349_v13 = vadd.f32 %v348_v5, %v347_v61  ;;  %v359_v61 = vadd.f32 %v358_v43, %v357_v26  ;;  %v377_v5 = vadd.f32 %v376_v53, %v375_v38 }
  0x8d   : > { %v333_v16 = vadd.f32 %v332_v8, %v331_v63  ;;  %v344_v17 = vrot.slane %v343_v9, 1 }
  0x8e   : > { %v339_v20 = vadd.f32 %v338_v12, %v337_v4  ;;  %v350_v21 = vrot.slane %v349_v13, 1  ;;  %v371_v4 = vadd.f32 %v370_v52, %v369_v37  ;;  %v360_v10 = vrot.slane %v359_v61, 1 }
  0x8f   : > { %v345_v25 = vadd.f32 %v344_v17, %v343_v9  ;;  %766 = vlog2.f32 %v333_v16  ;;  %v366_v12 = vrot.slane %v365_v62, 1  ;;  %v378_v15 = vrot.slane %v377_v5, 1 }
  0x90   : > { %v351_v36 = vadd.f32 %v350_v21, %v349_v13  ;;  %768 = vlog2.f32 %v339_v20  ;;  %v372_v14 = vrot.slane %v371_v4, 1  ;;  %v361_v17 = vadd.f32 %v360_v10, %v359_v61 }
  0x91   : > { %770 = vlog2.f32 %v345_v25  ;;  %v448_v20 = vunpack.c.l.s4 %v956_v19  ;;  %v367_v21 = vadd.f32 %v366_v12, %v365_v62  ;;  %v379_v25 = vadd.f32 %v378_v15, %v377_v5 }
  0x92   : > { %772 = vlog2.f32 %v351_v36  ;;  %v373_v23 = vadd.f32 %v372_v14, %v371_v4 }
  0x99   : > { %v767_v63 = vpop.eup %766 }
  0x9a   : > { %v769_v9 = vpop.eup %768  ;;  %v426_v18 = vmul.f32 0.6931472, %v767_v63 }
  0x9b   : > { %v771_v13 = vpop.eup %770  ;;  %v428_v22 = vmul.f32 0.6931472, %v769_v9 }
  0x9c   : > { %v773_v16 = vpop.eup %772  ;;  %v433_v27 = vsub.f32 %v426_v18, %v361_v17 }
  0x9d   : > { %v432_v26 = vmul.f32 0.6931472, %v773_v16 }
  0xe7   : > { %v391_v24 = vpop.permute.xlu0 %390 }
  0xe8   : > { %v393_v28 = vsel %vm1234_vm9, %v391_v24, inf  ;;  %v394_v29 = vsel %vm385_vm10, %v391_v24, inf  ;;  %v395_v30 = vsel %vm386_vm11, %v391_v24, inf  ;;  %v396_v31 = vsel %vm387_vm12, %v391_v24, inf }
  0xe9   : > { %v397_v32 = vrot.slane %v393_v28, 4  ;;  %v403_v33 = vrot.slane %v394_v29, 4  ;;  %v409_v34 = vrot.slane %v395_v30, 4  ;;  %v415_v35 = vrot.slane %v396_v31, 4 }
  0xea   : > { %v430_v24 = vmul.f32 0.6931472, %v771_v13 }
  0xeb   : > { %v398_v39 = vmin.f32 %v393_v28, %v397_v32  ;;  %v404_v40 = vmin.f32 %v394_v29, %v403_v33  ;;  %v410_v41 = vmin.f32 %v395_v30, %v409_v34  ;;  %v416_v42 = vmin.f32 %v396_v31, %v415_v35 }
  0xec   : > { %v449_v28 = vunpack.c.0.s8 %v448_v20  ;;  %v434_v29 = vsub.f32 %v428_v22, %v367_v21  ;;  %v435_v30 = vsub.f32 %v430_v24, %v373_v23  ;;  %v436_v32 = vsub.f32 %v432_v26, %v379_v25 }
  0xed   : > { %v399_v47 = vrot.slane %v398_v39, 2  ;;  %v405_v48 = vrot.slane %v404_v40, 2  ;;  %v411_v49 = vrot.slane %v410_v41, 2  ;;  %v417_v51 = vrot.slane %v416_v42, 2 }
  0xee   : > { %v452_v36 = vsub.s32 %v449_v28, %v1190_v45 }
  0xef   : > { %v400_v55 = vmin.f32 %v398_v39, %v399_v47  ;;  %v406_v56 = vmin.f32 %v404_v40, %v405_v48  ;;  %v412_v59 = vmin.f32 %v410_v41, %v411_v49  ;;  %v418_v60 = vmin.f32 %v416_v42, %v417_v51 }
  0xf0   : > { %v957_v47 = vmov 1983009808   ;;  %v958_v51 = vmov 0.0  }
  0xf1   : > { %v401_v0 = vrot.slane %v400_v55, 1  ;;  %v407_v1 = vrot.slane %v406_v56, 1  ;;  %v413_v2 = vrot.slane %v412_v59, 1  ;;  %v419_v3 = vrot.slane %v418_v60, 1 }
  0xf2   : > { %v528_v48 = vunpack.c.l.s4 %v957_v47  ;;  %v654_v52 = vsel %vm268_vm0, 1.0, %v958_v51 }
  0xf3   : > { %v402_v6 = vmin.f32 %v400_v55, %v401_v0  ;;  %v408_v7 = vmin.f32 %v406_v56, %v407_v1  ;;  %v414_v8 = vmin.f32 %v412_v59, %v413_v2  ;;  %v420_v11 = vmin.f32 %v418_v60, %v419_v3 }
  0xf4   : > { %v529_v55 = vunpack.c.0.s8 %v528_v48  ;;  %v500_v56 = vrot.slane %v654_v52, %v1194_v50  ;;  %v504_v59 = vrot.slane %v654_v52, %v1200_v54  ;;  %v508_v60 = vrot.slane %v654_v52, %v1203_v57 }
  0xf5   : > { %774 = vrcp.f32 %v402_v6  ;;  %v512_v61 = vrot.slane %v654_v52, %v1206_v58 }
  0xf6   : > { %776 = vrcp.f32 %v408_v7  ;;  %v532_v3 = vsub.s32 %v529_v55, %v1190_v45 }
  0xf7   : > { %778 = vrcp.f32 %v414_v8 }
  0xf8   : > { %780 = vrcp.f32 %v420_v11  ;;  %v473_v11 = vld [vmem:[#allocation7] sm:$0xff] }
  0xff   : > { %v775_v31 = vpop.eup %774 }
 0x100   : > { %v777_v33 = vpop.eup %776  ;;  %v437_v34 = vmul.f32 %v775_v31, %v433_v27 }
 0x101   : > { %v779_v35 = vpop.eup %778  ;;  %v438_v37 = vmul.f32 %v777_v33, %v434_v29 }
 0x102   : > { %v781_v38 = vpop.eup %780  ;;  %v439_v39 = vmul.f32 %v779_v35, %v435_v30 }
 0x103   : > { %v440_v40 = vmul.f32 %v781_v38, %v436_v32  ;;  %v445_v41 = vcombine.low %v437_v34, %v438_v37 }
 0x105   : > { %v446_v42 = vcombine.low %v439_v39, %v440_v40  ;;  %v453_v43 = vrot.slane %v445_v41, %v452_v36 }
 0x107   : > { %v460_v46 = vrot.slane %v446_v42, %v452_v36 }
 0x109   : > { %v461_v49 = vcombine.low %v453_v43, %v460_v46 }
 0x10b   : > { %v468_v53 = vrot.slane %v461_v49, %v452_v36 }
 0x10d   : > { %v470_v62 = vsel %vm268_vm0, %v468_v53, 0.0 }
 0x10e   : > { %v479_v63 = vrot.slane %v470_v62, %v1194_v50  ;;  %v483_v0 = vrot.slane %v470_v62, %v1200_v54  ;;  %v487_v1 = vrot.slane %v470_v62, %v1203_v57  ;;  %v491_v2 = vrot.slane %v470_v62, %v1206_v58 }
 0x110   : > { %v517_v4 = vsel %vm474_vm13, %v479_v63, %v500_v56  ;;  %v518_v5 = vsel %vm474_vm13, %v483_v0, %v504_v59  ;;  %v519_v6 = vsel %vm474_vm13, %v487_v1, %v508_v60  ;;  %v520_v7 = vsel %vm474_vm13, %v491_v2, %v512_v61 }
 0x111   : > { %v525_v8 = vcombine.low %v517_v4, %v518_v5  ;;  %v526_v44 = vcombine.low %v519_v6, %v520_v7 }
 0x113   : > { %v533_v9 = vrot.slane %v525_v8, %v532_v3  ;;  %v540_v10 = vrot.slane %v526_v44, %v532_v3 }
 0x115   : > { %v541_v50 = vcombine.low %v533_v9, %v540_v10 }
 0x117   : > { %v543_v54 = vadd.f32 %v541_v50, %v473_v11 }
 0x119   : > { %544 = vst [vmem:[#allocation7] sm:$0xff] %v543_v54 }
 0x11a   : > { %855 = shalt.err (!%p852_p10)
}
 0x11b   : > { %s856_s21 = scalar_lea.hbm %s1315_s3, 128 }
 0x11c   : > { %p857_p8 = scmp.ne.s32.totalorder %s1315_s3, %s856_s21  ;;  %p862_p7 = scmp.lt.u32.totalorder %s856_s21, %s1315_s3 }
 0x11e   : > { %p858_p13 = pnand %p857_p8, %p1259_p5 }
 0x120   : > { %p859_p1 = pneg %p858_p13 }
 0x122   : > { %p864_p12 = pnand %p862_p7, %p859_p1 }
 0x124   : > { %867 = shalt.err (!%p864_p12)
}
 0x125   : > { %666 = dma.vmem_to_hbm [thread:$0]  (%p1259_p5), %s556_s28, 128, %s1315_s3, [#allocation4]  }
 0x126   : > { %913 = dma.done.wait (%p1259_p5), [#allocation4], 128  }
 0x127   : > { %915 = vsyncadd (%p1259_p5), [#allocation4], 4294967168 }
 0x128 PF: > { %s20_s20 = sadd.s32 1, %s950_s20   ;;  %s1339_s12 = smov %s922_s13 }
 0x129   : > { %p17_p2 = scmp.ge.s32.totalorder %s20_s20, 6   ;;  %s1340_s13 = smov %s926_s14 }
 0x12a   : > { %s1341_s14 = smov %s1111_s26  ;;  %s1342_s15 = smov %s934_s16 }
 0x12b   : > { %s1343_s16 = smov %s938_s17  ;;  %s1344_s17 = smov %s1053_s4 }
 0x12c   : > { %s1345_s18 = smov %s946_s19  ;;  %s1346_s19 = smov %s1348_s22 }
 0x12d   :  { %19 = sbr.rel (!%p17_p2) target bundleno = 9 (0x9), region = 87 }
 0x134   :  { %568 = vsyncpa [#allocation3], 1 }
 0x135   :  { %570 = vsyncpa [#allocation3 + $0x1], 1 }
 0x136   :  { %571 = vsyncpa [#allocation6], 1 }
 0x137   :  { %573 = vsyncpa [#allocation6 + $0x1], 1 }
 0x138   :  { %574 = vsyncpa [#allocation4], 1 }
 0x139   :  { %576 = vsyncpa [#allocation4 + $0x1], 1 }

</bundles_post_ra>
